<compile_context>
chip_gen: v7x
topology: tpu7x:2x2x1
jax: 0.10.0
libtpu: 0.0.40
codegen_flags: <defaults>
</compile_context>

<pallas_src>
import jax
import jax.numpy as jnp
from jax.experimental import pallas as pl
from jax.experimental.pallas import tpu as pltpu


def _round_up(x, m):
    return ((x + m - 1) // m) * m


def _vmem_capacity_bytes():
    """Physical VMEM per TensorCore; fall back to 128 MiB (v5e/v6e) if the query fails."""
    try:
        cap = int(pltpu.get_tpu_info().vmem_capacity_bytes)
        if cap > 0:
            return max(cap, 64 << 20)
    except Exception:
        pass
    return 128 << 20


# --------------------------------------------------------------------------
# Kernel 1: streaming Gram accumulation over the flattened feature dim.
# --------------------------------------------------------------------------
def _gram_kernel(fs_ref, ft_ref, gs_ref, gt_ref, gs_acc, gt_acc):
    k = pl.program_id(1)

    @pl.when(k == 0)
    def _init():
        gs_acc[...] = jnp.zeros_like(gs_acc)
        gt_acc[...] = jnp.zeros_like(gt_acc)

    # Stream a (B, TK) chunk of each feature map; accumulate Gram in f32.
    # a @ a^T via contraction on dim 1 of both operands — same native
    # transposed-RHS MXU form as the flash-attention S = Q K^T pattern.
    # TODO(synk): verify in the lowered bundle that no lane-sparse (TK, B)
    # relayout is materialized; if it is, switch to pl.dot(fs, fs, trans_b=True).
    fs = fs_ref[...]
    ft = ft_ref[...]
    gs_acc[...] += jax.lax.dot_general(
        fs, fs, (((1,), (1,)), ((), ())), preferred_element_type=jnp.float32)
    gt_acc[...] += jax.lax.dot_general(
        ft, ft, (((1,), (1,)), ((), ())), preferred_element_type=jnp.float32)

    @pl.when(k == pl.num_programs(1) - 1)
    def _store():
        gs_ref[0] = gs_acc[...]
        gt_ref[0] = gt_acc[...]


# --------------------------------------------------------------------------
# Kernel 2: tiny finalize — BCE + Gram normalize + MSE + beta_0 combine.
# --------------------------------------------------------------------------
def _combine_kernel(beta_ref, inputs_ref, targets_ref, gs_ref, gt_ref, out_ref):
    # loss1: BCELoss (mean reduction), log clamped at -100 like PyTorch.
    p = inputs_ref[...].astype(jnp.float32)
    t = targets_ref[...].astype(jnp.float32)
    logp = jnp.maximum(jnp.log(p), -100.0)
    log1mp = jnp.maximum(jnp.log(1.0 - p), -100.0)
    loss1 = jnp.mean(-(t * logp + (1.0 - t) * log1mp))

    # loss2: similarity-preserving KD (row-L2-normalized Gram MSE).
    Gs = jnp.sum(gs_ref[...], axis=0)
    Gt = jnp.sum(gt_ref[...], axis=0)
    ns = jnp.sqrt(jnp.sum(Gs * Gs, axis=1, keepdims=True))
    nt = jnp.sqrt(jnp.sum(Gt * Gt, axis=1, keepdims=True))
    Gs_n = Gs / jnp.maximum(ns, 1e-12)   # F.normalize(..., dim=1, eps=1e-12)
    Gt_n = Gt / jnp.maximum(nt, 1e-12)
    loss2 = jnp.mean((Gs_n - Gt_n) ** 2)  # F.mse_loss, mean reduction

    out_ref[0, 0] = beta_ref[0, 0] * loss2 + loss1


# --------------------------------------------------------------------------
# Tiling / VMEM budgeting (generation-aware).
# --------------------------------------------------------------------------
def _pick_tiling(B, D, itemsize, tk_cap):
    cap = _vmem_capacity_bytes()
    tk_cap = max(128, (int(tk_cap) // 128) * 128)

    # Accumulators + partial-Gram output blocks + slack live alongside the
    # feature double-buffers; account for them inside the budget.
    extras = 2 * B * B * 4 + 4 * B * B * 4 + (4 << 20)

    # Feature double-buffer budget: 2 streams x 2 buffers x (B, TK) blocks.
    # ~50% of physical VMEM: ~28 MiB on v7x (64 MiB), 48 MiB on v5e/v6e (128 MiB).
    feat_budget = min(48 << 20, max(8 << 20, cap // 2 - extras))

    tk = feat_budget // (4 * B * itemsize)
    tk = min(tk_cap, max(512, (tk // 128) * 128))
    tk = min(tk, _round_up(D, 128))

    n_k = pl.cdiv(D, tk)
    # Split the D reduction into two halves: on v7x the leading "parallel"
    # grid axis is sharded across the 2 TensorCores (~2x streaming BW); on
    # single-TC chips (v5e/v6e) it simply runs serially with the same work.
    num_splits = 2 if n_k >= 2 else 1
    nk_per = pl.cdiv(n_k, num_splits)
    d_pad = num_splits * nk_per * tk

    working = 4 * B * tk * itemsize            # 2 streams x 2 buffers
    vmem_limit = int(working + extras + (4 << 20))
    vmem_limit = max(vmem_limit, 32 << 20)
    vmem_limit = min(vmem_limit, int(0.9 * cap))
    return tk, num_splits, nk_per, d_pad, vmem_limit


def custom_loss(inputs, targets, features, features2, beta_0=1.0, tk_cap=131072):
    """JAX/Pallas equivalent of CustomLoss.forward. Returns a scalar f32."""
    B = features.shape[0]
    # Flatten NCHW -> (B, C*H*W); contiguous, identical to torch .view(B, -1).
    fs = features.reshape(B, -1)
    ft = features2.reshape(B, -1)
    D = fs.shape[1]
    itemsize = jnp.dtype(fs.dtype).itemsize

    TK, num_splits, nk_per, D_pad, vmem_limit = _pick_tiling(B, D, itemsize, tk_cap)
    if D_pad != D:
        # Zero-padding the contraction dim leaves the Gram matrices unchanged.
        fs = jnp.pad(fs, ((0, 0), (0, D_pad - D)))
        ft = jnp.pad(ft, ((0, 0), (0, D_pad - D)))

    feat_spec = pl.BlockSpec((B, TK), lambda s, k: (0, s * nk_per + k))
    gram_out_spec = pl.BlockSpec((1, B, B), lambda s, k: (s, 0, 0))

    gs_part, gt_part = pl.pallas_call(
        _gram_kernel,
        out_shape=(jax.ShapeDtypeStruct((num_splits, B, B), jnp.float32),
                   jax.ShapeDtypeStruct((num_splits, B, B), jnp.float32)),
        grid=(num_splits, nk_per),
        in_specs=[feat_spec, feat_spec],
        out_specs=(gram_out_spec, gram_out_spec),
        scratch_shapes=[
            pltpu.VMEM((B, B), jnp.float32),  # Gs accumulator
            pltpu.VMEM((B, B), jnp.float32),  # Gt accumulator
        ],
        compiler_params=pltpu.CompilerParams(
            dimension_semantics=("parallel", "arbitrary"),
            vmem_limit_bytes=vmem_limit,
        ),
    )(fs, ft)

    beta = jnp.asarray(beta_0, jnp.float32).reshape(1, 1)
    out = pl.pallas_call(
        _combine_kernel,
        out_shape=jax.ShapeDtypeStruct((1, 1), jnp.float32),
        in_specs=[
            pl.BlockSpec(memory_space=pltpu.MemorySpace.SMEM),  # beta_0 scalar
            pl.BlockSpec(memory_space=pltpu.MemorySpace.VMEM),  # inputs
            pl.BlockSpec(memory_space=pltpu.MemorySpace.VMEM),  # targets
            pl.BlockSpec(memory_space=pltpu.MemorySpace.VMEM),  # Gs partials
            pl.BlockSpec(memory_space=pltpu.MemorySpace.VMEM),  # Gt partials
        ],
        out_specs=pl.BlockSpec(memory_space=pltpu.MemorySpace.SMEM),
    )(beta, inputs, targets, gs_part, gt_part)
    return out[0, 0]


def _custom_loss_ref(inputs, targets, features, features2, beta_0=1.0):
    # Pure-JAX reference for correctness checking.
    p = inputs.astype(jnp.float32)
    t = targets.astype(jnp.float32)
    loss1 = jnp.mean(-(t * jnp.maximum(jnp.log(p), -100.0)
                       + (1.0 - t) * jnp.maximum(jnp.log(1.0 - p), -100.0)))
    B = features.shape[0]
    fs = features.reshape(B, -1).astype(jnp.float32)
    ft = features2.reshape(B, -1).astype(jnp.float32)
    Gs = fs @ fs.T
    Gt = ft @ ft.T
    Gs_n = Gs / jnp.maximum(jnp.linalg.norm(Gs, axis=1, keepdims=True), 1e-12)
    Gt_n = Gt / jnp.maximum(jnp.linalg.norm(Gt, axis=1, keepdims=True), 1e-12)
    loss2 = jnp.mean((Gs_n - Gt_n) ** 2)
    return beta_0 * loss2 + loss1


if __name__ == "__main__":
    key = jax.random.PRNGKey(0)
    k1, k2, k3, k4 = jax.random.split(key, 4)

    # Case 1: small NCHW feature maps, D = 4*16*16 = 1024 (single chunk).
    B, N_CLS = 8, 32
    C, H, W = 4, 16, 16
    inputs = jax.nn.sigmoid(jax.random.normal(k1, (B, N_CLS), jnp.float32))
    targets = (jax.random.uniform(k2, (B, N_CLS)) > 0.5).astype(jnp.float32)
    features = jax.random.normal(k3, (B, C, H, W), jnp.float32)
    features2 = jax.random.normal(k4, (B, C, H, W), jnp.float32)

    out = custom_loss(inputs, targets, features, features2, beta_0=1.0)
    jax.block_until_ready(out)
    ref = _custom_loss_ref(inputs, targets, features, features2, beta_0=1.0)
    assert jnp.allclose(out, ref, rtol=1e-5, atol=1e-5), (out, ref)

    # Case 2: D = 3*10*10 = 300, not a multiple of 128 -> exercises the pad path.
    featA = jax.random.normal(jax.random.PRNGKey(1), (B, 3, 10, 10), jnp.float32)
    featB = jax.random.normal(jax.random.PRNGKey(2), (B, 3, 10, 10), jnp.float32)
    out2 = custom_loss(inputs, targets, featA, featB, beta_0=0.5)
    jax.block_until_ready(out2)
    ref2 = _custom_loss_ref(inputs, targets, featA, featB, beta_0=0.5)
    assert jnp.allclose(out2, ref2, rtol=1e-5, atol=1e-5), (out2, ref2)

    # Case 3: small tk_cap forces multiple chunks -> exercises the 2-way
    # parallel split of the D reduction (dual-TC path on v7x) plus padding.
    featC = jax.random.normal(jax.random.PRNGKey(3), (B, 5, 13, 13), jnp.float32)
    featD = jax.random.normal(jax.random.PRNGKey(4), (B, 5, 13, 13), jnp.float32)
    out3 = custom_loss(inputs, targets, featC, featD, beta_0=2.0, tk_cap=256)
    jax.block_until_ready(out3)
    ref3 = _custom_loss_ref(inputs, targets, featC, featD, beta_0=2.0)
    assert jnp.allclose(out3, ref3, rtol=1e-5, atol=1e-5), (out3, ref3)

    print("KERNEL_OK")
</pallas_src>

<mosaic_0001>
module attributes {stable_mosaic.version = 11 : i64} {
  func.func @_gram_kernel(%arg0: i32, %arg1: i32, %arg2: memref<8x1024xf32, #tpu.memory_space<vmem>>, %arg3: memref<8x1024xf32, #tpu.memory_space<vmem>>, %arg4: memref<1x8x8xf32, #tpu.memory_space<vmem>>, %arg5: memref<1x8x8xf32, #tpu.memory_space<vmem>>, %arg6: memref<8x8xf32, #tpu.memory_space<vmem>>, %arg7: memref<8x8xf32, #tpu.memory_space<vmem>>) attributes {dimension_semantics = [#tpu.dimension_semantics<parallel>, #tpu.dimension_semantics<arbitrary>], iteration_bounds = array<i64: 1, 1>, scalar_prefetch = 0 : i64, scratch_operands = 2 : i64, tpu.core_type = #tpu.core_type<tc>, window_params = [{transform_indices = @transform_0, window_bounds = array<i64: 8, 1024>}, {transform_indices = @transform_1, window_bounds = array<i64: 8, 1024>}, {transform_indices = @transform_2, window_bounds = array<i64: 1, 8, 8>}, {transform_indices = @transform_3, window_bounds = array<i64: 1, 8, 8>}]} {
    %c0_i32 = arith.constant 0 : i32
    %0 = arith.cmpi eq, %arg1, %c0_i32 : i32
    %1 = arith.extui %0 : i1 to i32
    %c0_i32_0 = arith.constant 0 : i32
    %2 = arith.cmpi ne, %1, %c0_i32_0 : i32
    scf.if %2 {
      %cst_15 = arith.constant 0.000000e+00 : f32
      %16 = vector.broadcast %cst_15 : f32 to vector<8x8xf32>
      %c0_16 = arith.constant 0 : index
      %c0_17 = arith.constant 0 : index
      %17 = vector.load %arg6[%c0_16, %c0_17] : memref<8x8xf32, #tpu.memory_space<vmem>>, vector<8x8xf32>
      tpu.vector_store %arg6[%c0_16, %c0_17], %16 {strides = array<i32>} : memref<8x8xf32, #tpu.memory_space<vmem>>, vector<8x8xf32>,
      %cst_18 = arith.constant 0.000000e+00 : f32
      %18 = vector.broadcast %cst_18 : f32 to vector<8x8xf32>
      %c0_19 = arith.constant 0 : index
      %c0_20 = arith.constant 0 : index
      %19 = vector.load %arg7[%c0_19, %c0_20] : memref<8x8xf32, #tpu.memory_space<vmem>>, vector<8x8xf32>
      tpu.vector_store %arg7[%c0_19, %c0_20], %18 {strides = array<i32>} : memref<8x8xf32, #tpu.memory_space<vmem>>, vector<8x8xf32>,
    } else {
    }
    %c0 = arith.constant 0 : index
    %c0_1 = arith.constant 0 : index
    %3 = vector.load %arg2[%c0, %c0_1] : memref<8x1024xf32, #tpu.memory_space<vmem>>, vector<8x1024xf32>
    %c0_2 = arith.constant 0 : index
    %c0_3 = arith.constant 0 : index
    %4 = vector.load %arg3[%c0_2, %c0_3] : memref<8x1024xf32, #tpu.memory_space<vmem>>, vector<8x1024xf32>
    %c0_4 = arith.constant 0 : index
    %c0_5 = arith.constant 0 : index
    %5 = vector.load %arg6[%c0_4, %c0_5] : memref<8x8xf32, #tpu.memory_space<vmem>>, vector<8x8xf32>
    %cst = arith.constant dense<0.000000e+00> : vector<8x8xf32>
    %6 = tpu.matmul %3, %3, %cst {dimension_numbers = #tpu.dot_dimension_numbers<[1], [1], [0], [0], [0, 0, 1, 0], [], []>} : vector<8x1024xf32>, vector<8x1024xf32>, vector<8x8xf32> -> vector<8x8xf32>
    %7 = arith.addf %5, %6 : vector<8x8xf32>
    %c0_6 = arith.constant 0 : index
    %c0_7 = arith.constant 0 : index
    %8 = vector.load %arg6[%c0_6, %c0_7] : memref<8x8xf32, #tpu.memory_space<vmem>>, vector<8x8xf32>
    tpu.vector_store %arg6[%c0_6, %c0_7], %7 {strides = array<i32>} : memref<8x8xf32, #tpu.memory_space<vmem>>, vector<8x8xf32>,
    %c0_8 = arith.constant 0 : index
    %c0_9 = arith.constant 0 : index
    %9 = vector.load %arg7[%c0_8, %c0_9] : memref<8x8xf32, #tpu.memory_space<vmem>>, vector<8x8xf32>
    %cst_10 = arith.constant dense<0.000000e+00> : vector<8x8xf32>
    %10 = tpu.matmul %4, %4, %cst_10 {dimension_numbers = #tpu.dot_dimension_numbers<[1], [1], [0], [0], [0, 0, 1, 0], [], []>} : vector<8x1024xf32>, vector<8x1024xf32>, vector<8x8xf32> -> vector<8x8xf32>
    %11 = arith.addf %9, %10 : vector<8x8xf32>
    %c0_11 = arith.constant 0 : index
    %c0_12 = arith.constant 0 : index
    %12 = vector.load %arg7[%c0_11, %c0_12] : memref<8x8xf32, #tpu.memory_space<vmem>>, vector<8x8xf32>
    tpu.vector_store %arg7[%c0_11, %c0_12], %11 {strides = array<i32>} : memref<8x8xf32, #tpu.memory_space<vmem>>, vector<8x8xf32>,
    %c0_i32_13 = arith.constant 0 : i32
    %13 = arith.cmpi eq, %arg1, %c0_i32_13 : i32
    %14 = arith.extui %13 : i1 to i32
    %c0_i32_14 = arith.constant 0 : i32
    %15 = arith.cmpi ne, %14, %c0_i32_14 : i32
    scf.if %15 {
      %c0_15 = arith.constant 0 : index
      %c0_16 = arith.constant 0 : index
      %16 = vector.load %arg6[%c0_15, %c0_16] : memref<8x8xf32, #tpu.memory_space<vmem>>, vector<8x8xf32>
      %c0_17 = arith.constant 0 : index
      %c0_18 = arith.constant 0 : index
      %c0_19 = arith.constant 0 : index
      %17 = vector.load %arg4[%c0_17, %c0_18, %c0_19] : memref<1x8x8xf32, #tpu.memory_space<vmem>>, vector<1x8x8xf32>
      %18 = vector.shape_cast %17 : vector<1x8x8xf32> to vector<8x8xf32>
      %19 = vector.shape_cast %16 : vector<8x8xf32> to vector<1x8x8xf32>
      tpu.vector_store %arg4[%c0_17, %c0_18, %c0_19], %19 {strides = array<i32>} : memref<1x8x8xf32, #tpu.memory_space<vmem>>, vector<1x8x8xf32>,
      %c0_20 = arith.constant 0 : index
      %c0_21 = arith.constant 0 : index
      %20 = vector.load %arg7[%c0_20, %c0_21] : memref<8x8xf32, #tpu.memory_space<vmem>>, vector<8x8xf32>
      %c0_22 = arith.constant 0 : index
      %c0_23 = arith.constant 0 : index
      %c0_24 = arith.constant 0 : index
      %21 = vector.load %arg5[%c0_22, %c0_23, %c0_24] : memref<1x8x8xf32, #tpu.memory_space<vmem>>, vector<1x8x8xf32>
      %22 = vector.shape_cast %21 : vector<1x8x8xf32> to vector<8x8xf32>
      %23 = vector.shape_cast %20 : vector<8x8xf32> to vector<1x8x8xf32>
      tpu.vector_store %arg5[%c0_22, %c0_23, %c0_24], %23 {strides = array<i32>} : memref<1x8x8xf32, #tpu.memory_space<vmem>>, vector<1x8x8xf32>,
    } else {
    }
    return
  }
  func.func @transform_0(%arg0: i32, %arg1: i32) -> (i32, i32) {
    %c1_i32 = arith.constant 1 : i32
    %0 = arith.muli %arg0, %c1_i32 : i32
    %1 = arith.addi %0, %arg1 : i32
    %c0_i32 = arith.constant 0 : i32
    %c0_i32_0 = arith.constant 0 : i32
    return %c0_i32, %1 : i32, i32
  }
  func.func @transform_1(%arg0: i32, %arg1: i32) -> (i32, i32) {
    %c1_i32 = arith.constant 1 : i32
    %0 = arith.muli %arg0, %c1_i32 : i32
    %1 = arith.addi %0, %arg1 : i32
    %c0_i32 = arith.constant 0 : i32
    %c0_i32_0 = arith.constant 0 : i32
    return %c0_i32, %1 : i32, i32
  }
  func.func @transform_2(%arg0: i32, %arg1: i32) -> (i32, i32, i32) {
    %c0_i32 = arith.constant 0 : i32
    %c0_i32_0 = arith.constant 0 : i32
    %c0_i32_1 = arith.constant 0 : i32
    return %arg0, %c0_i32, %c0_i32_0 : i32, i32, i32
  }
  func.func @transform_3(%arg0: i32, %arg1: i32) -> (i32, i32, i32) {
    %c0_i32 = arith.constant 0 : i32
    %c0_i32_0 = arith.constant 0 : i32
    %c0_i32_1 = arith.constant 0 : i32
    return %arg0, %c0_i32, %c0_i32_0 : i32, i32, i32
  }
}

</mosaic_0001>

<bundles_post_ra>
// kernel: tpu_custom_call.1
= control target key start
LH: loop header
LB: loop body
LE: loop exit
PB: predicated region body
PF: predicated region fallthrough
CT: control target
= control target key end

     0   :  { %9 = vsyncpa [#allocation5], 0  ;;  %s858_s0 = inlined_call_operand.hbm [shape: f32[8,1024], index: 0, kind: input, shape index: {}]   ;;  %s859_s1 = inlined_call_operand.hbm [shape: f32[8,1024], index: 1, kind: input, shape index: {}]   ;;  %s860_s2 = inlined_call_operand.hbm [shape: f32[1,8,8], index: 2, kind: output, shape index: {0}]   ;;  %s861_s3 = inlined_call_operand.hbm [shape: f32[1,8,8], index: 3, kind: output, shape index: {1}]  }
   0x1   :  { %10 = vsyncpa [#allocation8], 0 }
   0x2   :  { %11 = vsyncpa [#allocation6], 0 }
   0x3   :  { %12 = vsyncpa [#allocation11], 0  ;;  %s779_s12 = smov [#allocation4]   ;;  %s780_s14 = smov [#allocation7]  }
   0x4   :  { %s23_s13 = sshll.u32 %s779_s12, 4  ;;  %s37_s15 = sshll.u32 %s780_s14, 4  ;;  %s24_s13 = int_to_ptr.vmem [resolvable:$true] %s23_s13  ;;  %s38_s15 = int_to_ptr.vmem [resolvable:$true] %s37_s15 }
   0x5   :  { %s683_s18 = scalar_lea.hbm %s858_s0, 1024 }
   0x6   :  { %p684_p0 = scmp.ne.s32.totalorder %s858_s0, %s683_s18  ;;  %p687_p1 = scmp.lt.u32.totalorder %s683_s18, %s858_s0 }
   0x8   :  { %p689_p2 = pnand %p687_p1, %p684_p0 }
   0xa   :  { %692 = shalt.err (!%p689_p2)
}
   0xb   :  { %s693_s23 = scalar_lea.vmem %s24_s13, 1024  ;;  %p698_p4 = scmp.lt.s32.totalorder %s24_s13, %s24_s13 }
   0xc   :  { %p694_p3 = scmp.ne.s32.totalorder %s24_s13, %s693_s23  ;;  %p699_p5 = scmp.lt.s32.totalorder %s693_s23, %s693_s23 }
   0xe   :  { %p700_p6 = por %p699_p5, %p698_p4 }
  0x10   :  { %p701_p7 = pnand %p700_p6, %p694_p3 }
  0x12   :  { %704 = shalt.err (!%p701_p7)
}
  0x13   :  { %26 = dma.hbm_to_vmem [thread:$0]  %s858_s0, 1024, %s24_s13, [#allocation5]  }
  0x14   :  { %s705_s28 = scalar_lea.hbm %s859_s1, 1024 }
  0x15   :  { %p706_p8 = scmp.ne.s32.totalorder %s859_s1, %s705_s28  ;;  %p709_p9 = scmp.lt.u32.totalorder %s705_s28, %s859_s1 }
  0x17   :  { %p711_p10 = pnand %p709_p9, %p706_p8 }
  0x19   :  { %714 = shalt.err (!%p711_p10)
}
  0x1a   :  { %s715_s6 = scalar_lea.vmem %s38_s15, 1024  ;;  %p720_p12 = scmp.lt.s32.totalorder %s38_s15, %s38_s15 }
  0x1b   :  { %p716_p11 = scmp.ne.s32.totalorder %s38_s15, %s715_s6  ;;  %p721_p13 = scmp.lt.s32.totalorder %s715_s6, %s715_s6 }
  0x1d   :  { %p722_p0 = por %p721_p13, %p720_p12 }
  0x1f   :  { %p723_p1 = pnand %p722_p0, %p716_p11 }
  0x21   :  { %726 = shalt.err (!%p723_p1)
}
  0x22   :  { %40 = dma.hbm_to_vmem [thread:$0]  %s859_s1, 1024, %s38_s15, [#allocation8]  }
  0x23   :  { %771 = dma.done.wait [#allocation5], 1024  }
  0x24   :  { %772 = vsyncadd [#allocation5], 4294966272 }
  0x25   :  { %773 = dma.done.wait [#allocation8], 1024  }
  0x26   :  { %774 = vsyncadd [#allocation8], 4294966272  ;;  %v59_v0 = vld [vmem:[#allocation4 + $0x8] sm:$0xff]  ;;  %v58_v1 = vld [vmem:[#allocation4] sm:$0xff]  ;;  %vm55_vm0 = vcmask 64512   ;;  %v781_v16 = vmov 0.0  }
  0x27   :  { %v61_v2 = vld [vmem:[#allocation4 + $0x18] sm:$0xff]  ;;  %75 = vmatprep.subr.mxu0 %v59_v0  ;;  %v60_v3 = vld [vmem:[#allocation4 + $0x10] sm:$0xff]  ;;  %v63_v4 = vld [vmem:[#allocation4 + $0x28] sm:$0xff]  ;;  %139 = vmatprep.mubr.f32.mxu0 %v59_v0  ;;  %56 = vst.msk [vmem:[#allocation2] sm:$0xff] %vm55_vm0, %v781_v16  ;;  %s782_s1 = smov [#allocation9]  }
  0x28   :  { %145 = vmatprep.subr.mxu1 %v61_v2  ;;  %76 = vmatpush1.xpose.msra.mxu0 %v58_v1  ;;  %v65_v5 = vld [vmem:[#allocation4 + $0x38] sm:$0xff]  ;;  %v62_v6 = vld [vmem:[#allocation4 + $0x20] sm:$0xff]  ;;  %v64_v7 = vld [vmem:[#allocation4 + $0x30] sm:$0xff]  ;;  %57 = vst.msk [vmem:[#allocation3] sm:$0xff] %vm55_vm0, %v781_v16  ;;  %s654_s8 = sshll.u32 %s782_s1, 4  ;;  %s655_s8 = int_to_ptr.vmem [resolvable:$true] %s654_s8 }
  0x29   :  { %146 = vmatpush1.xpose.msra.mxu1 %v60_v3  ;;  %209 = vmatprep.mubr.f32.mxu1 %v61_v2  ;;  %v67_v8 = vld [vmem:[#allocation7 + $0x8] sm:$0xff]  ;;  %v69_v9 = vld [vmem:[#allocation7 + $0x18] sm:$0xff]  ;;  %v66_v10 = vld [vmem:[#allocation7] sm:$0xff]  ;;  %s727_s9 = scalar_lea.vmem %s655_s8, 128  ;;  %p732_p3 = scmp.lt.s32.totalorder %s655_s8, %s655_s8 }
  0x2a   :  { %215 = vmatprep.subr.mxu0 %v63_v4  ;;  %285 = vmatprep.subr.mxu1 %v65_v5  ;;  %v68_v11 = vld [vmem:[#allocation7 + $0x10] sm:$0xff]  ;;  %v71_v12 = vld [vmem:[#allocation7 + $0x28] sm:$0xff]  ;;  %v73_v13 = vld [vmem:[#allocation7 + $0x38] sm:$0xff]  ;;  %p728_p2 = scmp.ne.s32.totalorder %s655_s8, %s727_s9  ;;  %p733_p4 = scmp.lt.s32.totalorder %s727_s9, %s727_s9 }
  0x2b   :  { %140 = vmatmul.mubr.f32.vlgmr.msra.gmra.mrb[0].mxu0 %v58_v1  ;;  %v70_v14 = vld [vmem:[#allocation7 + $0x20] sm:$0xff]  ;;  %v72_v15 = vld [vmem:[#allocation7 + $0x30] sm:$0xff] }
  0x2c   :  { %210 = vmatmul.mubr.f32.vlgmr.msra.gmra.mrb[0].mxu1 %v60_v3  ;;  %216 = vmatpush1.xpose.msra.mxu0 %v62_v6  ;;  %p734_p5 = por %p733_p4, %p732_p3 }
  0x2d   :  { %286 = vmatpush1.xpose.msra.mxu1 %v64_v7  ;;  %279 = vmatprep.mubr.f32.mxu0 %v63_v4 }
  0x2e   :  { %349 = vmatprep.mubr.f32.mxu1 %v65_v5  ;;  %359 = vmatprep.subr.mxu0 %v67_v8  ;;  %v74_v27 = vld [vmem:[#allocation2] sm:$0xff]  ;;  %p735_p6 = pnand %p734_p5, %p728_p2 }
  0x2f   :  { %429 = vmatprep.subr.mxu1 %v69_v9  ;;  %280 = vmatmul.mubr.f32.vlgmr.msra.gmra.mrb[2].mxu0 %v62_v6  ;;  %v358_v39 = vld [vmem:[#allocation3] sm:$0xff] }
  0x30   :  { %350 = vmatmul.mubr.f32.vlgmr.msra.gmra.mrb[2].mxu1 %v64_v7  ;;  %360 = vmatpush1.xpose.msra.mxu0 %v66_v10 }
  0x31   :  { %430 = vmatpush1.xpose.msra.mxu1 %v68_v11  ;;  %423 = vmatprep.mubr.f32.mxu0 %v67_v8 }
  0x32   :  { %493 = vmatprep.mubr.f32.mxu1 %v69_v9  ;;  %499 = vmatprep.subr.mxu0 %v71_v12 }
  0x33   :  { %569 = vmatprep.subr.mxu1 %v73_v13  ;;  %424 = vmatmul.mubr.f32.vlgmr.msra.gmra.mrb[4].mxu0 %v66_v10 }
  0x34   :  { %494 = vmatmul.mubr.f32.vlgmr.msra.gmra.mrb[4].mxu1 %v68_v11  ;;  %500 = vmatpush1.xpose.msra.mxu0 %v70_v14 }
  0x35   :  { %563 = vmatprep.mubr.f32.mxu0 %v71_v12  ;;  %570 = vmatpush1.xpose.msra.mxu1 %v72_v15 }
  0x36   :  { %633 = vmatprep.mubr.f32.mxu1 %v73_v13 }
  0x37   :  { %564 = vmatmul.mubr.f32.vlgmr.msra.gmra.mrb[6].mxu0 %v70_v14 }
  0x38   :  { %634 = vmatmul.mubr.f32.vlgmr.msra.gmra.mrb[6].mxu1 %v72_v15 }
  0xfe   :  { %v141_v17 = vpop.f32.mrb[0].mxu0 }
  0xff   :  { %v211_v18 = vpop.f32.mrb[0].mxu1  ;;  %v143_v19 = vpop.f32.mrb[1].mxu0 }
 0x100   :  { %v212_v20 = vadd.f32 %v211_v18, %v141_v17  ;;  %v213_v21 = vpop.f32.mrb[1].mxu1 }
 0x102   :  { %v281_v22 = vpop.f32.mrb[2].mxu0 }
 0x103   :  { %v351_v23 = vpop.f32.mrb[2].mxu1  ;;  %v282_v24 = vadd.f32 %v281_v22, %v212_v20  ;;  %v283_v25 = vpop.f32.mrb[3].mxu0 }
 0x104   :  { %v353_v26 = vpop.f32.mrb[3].mxu1 }
 0x105   :  { %v352_v28 = vadd.f32 %v351_v23, %v282_v24 }
 0x106   :  { %v425_v29 = vpop.f32.mrb[4].mxu0 }
 0x107   :  { %v495_v30 = vpop.f32.mrb[4].mxu1  ;;  %v355_v31 = vadd.f32 %v352_v28, %v74_v27  ;;  %v427_v32 = vpop.f32.mrb[5].mxu0 }
 0x108   :  { %v496_v33 = vadd.f32 %v495_v30, %v425_v29  ;;  %v497_v34 = vpop.f32.mrb[5].mxu1 }
 0x109   :  { %357 = vst.msk [vmem:[#allocation2] sm:$0xff] %vm55_vm0, %v355_v31 }
 0x10a   :  { %v565_v35 = vpop.f32.mrb[6].mxu0 }
 0x10b   :  { %v566_v36 = vadd.f32 %v565_v35, %v496_v33  ;;  %v567_v37 = vpop.f32.mrb[7].mxu0  ;;  %v635_v38 = vpop.f32.mrb[6].mxu1 }
 0x10c   :  { %v637_v40 = vpop.f32.mrb[7].mxu1 }
 0x10d   :  { %v636_v41 = vadd.f32 %v635_v38, %v566_v36 }
 0x10f   :  { %v639_v42 = vadd.f32 %v636_v41, %v358_v39 }
 0x110   :  { %v644_v43 = vld [vmem:[#allocation2] sm:$0xff] }
 0x111   :  { %640 = vst.msk [vmem:[#allocation3] sm:$0xff] %vm55_vm0, %v639_v42  ;;  %645 = vst.msk [vmem:[#allocation9] sm:$0xff] %vm55_vm0, %v644_v43 }
 0x112   :  { %738 = shalt.err (!%p735_p6)
}
 0x113   :  { %s739_s12 = scalar_lea.hbm %s860_s2, 128 }
 0x114   :  { %p740_p7 = scmp.ne.s32.totalorder %s860_s2, %s739_s12  ;;  %p743_p8 = scmp.lt.u32.totalorder %s739_s12, %s860_s2 }
 0x116   :  { %p745_p9 = pnand %p743_p8, %p740_p7 }
 0x118   :  { %748 = shalt.err (!%p745_p9)
}
 0x119   :  { %657 = dma.vmem_to_hbm [thread:$0]  %s655_s8, 128, %s860_s2, [#allocation6]   ;;  %v646_v44 = vld [vmem:[#allocation3] sm:$0xff] }
 0x11a   :  { %s783_s19 = smov [#allocation10]   ;;  %647 = vst.msk [vmem:[#allocation10] sm:$0xff] %vm55_vm0, %v646_v44 }
 0x11b   :  { %s664_s20 = sshll.u32 %s783_s19, 4  ;;  %s665_s20 = int_to_ptr.vmem [resolvable:$true] %s664_s20 }
 0x11c   :  { %s749_s21 = scalar_lea.vmem %s665_s20, 128  ;;  %p754_p11 = scmp.lt.s32.totalorder %s665_s20, %s665_s20 }
 0x11d   :  { %p750_p10 = scmp.ne.s32.totalorder %s665_s20, %s749_s21  ;;  %p755_p12 = scmp.lt.s32.totalorder %s749_s21, %s749_s21 }
 0x11f   :  { %p756_p13 = por %p755_p12, %p754_p11 }
 0x121   :  { %p757_p0 = pnand %p756_p13, %p750_p10 }
 0x123   :  { %760 = shalt.err (!%p757_p0)
}
 0x124   :  { %s761_s24 = scalar_lea.hbm %s861_s3, 128 }
 0x125   :  { %p762_p1 = scmp.ne.s32.totalorder %s861_s3, %s761_s24  ;;  %p765_p2 = scmp.lt.u32.totalorder %s761_s24, %s861_s3 }
 0x127   :  { %p767_p3 = pnand %p765_p2, %p762_p1 }
 0x129   :  { %770 = shalt.err (!%p767_p3)
}
 0x12a   :  { %667 = dma.vmem_to_hbm [thread:$0]  %s665_s20, 128, %s861_s3, [#allocation11]  }
 0x12b   :  { %775 = dma.done.wait [#allocation6], 128  }
 0x12c   :  { %776 = vsyncadd [#allocation6], 4294967168 }
 0x12d   :  { %777 = dma.done.wait [#allocation11], 128  }
 0x12e   :  { %778 = vsyncadd [#allocation11], 4294967168 }
 0x12f   :  { %674 = vsyncpa [#allocation5], 1 }
 0x130   :  { %675 = vsyncpa [#allocation8], 1 }
 0x131   :  { %676 = vsyncpa [#allocation6], 1 }
 0x132   :  { %677 = vsyncpa [#allocation11], 1 }

</bundles_post_ra>
